<compile_context>
chip_gen: v7x
topology: tpu7x:2x2x1
jax: 0.10.0
libtpu: 0.0.40
codegen_flags: <defaults>
</compile_context>

<pallas_src>
import functools

import jax
import jax.numpy as jnp
from jax import lax
from jax.experimental import pallas as pl
from jax.experimental.pallas import tpu as pltpu


def _vmem_limit_bytes():
    cap = 128 * 1024 * 1024
    try:
        info = pltpu.get_tpu_info()
        cap = int(getattr(info, "vmem_capacity_bytes", cap))
    except Exception:
        pass
    # Leave headroom for Mosaic internal scratch / semaphores:
    # v5e/v6e (128 MiB) -> 112 MiB, v7x (64 MiB) -> 56 MiB.
    return min(cap * 7 // 8, 112 * 1024 * 1024)


_VMEM_LIMIT = _vmem_limit_bytes()


def _cparams(*sem):
    return pltpu.CompilerParams(dimension_semantics=tuple(sem),
                                vmem_limit_bytes=_VMEM_LIMIT)


def _pick_tile(dim, target, align):
    """Largest tile <= target that divides `dim` and is a multiple of `align`.
    Falls back to the full dim (always legal).
    TODO(synk): for awkward M=B*S, pad M to a multiple of 256 in the wrapper instead of
    falling back to the full dimension (latent VMEM blow-up for huge dims)."""
    if dim <= target:
        return dim
    t = (min(target, dim) // align) * align
    while t >= align:
        if dim % t == 0:
            return t
        t -= align
    return dim


def _ln_f32(x, g, b, eps=1e-5):
    mean = jnp.mean(x, axis=-1, keepdims=True)
    var = jnp.mean(jnp.square(x - mean), axis=-1, keepdims=True)
    return (x - mean) * lax.rsqrt(var + eps) * g + b


# ----------------------------------------------------------------------------
# Pallas kernels
# ----------------------------------------------------------------------------
def _mlp_tanh_kernel(x_ref, w1_ref, b1_ref, w2_ref, b2_ref, o_ref, h_sc):
    """clip_project: tanh(x @ W1 + b1) @ W2 + b2.
    First matmul + tanh computed once per row tile (j==0) into VMEM scratch."""
    @pl.when(pl.program_id(1) == 0)
    def _():
        h = jnp.dot(x_ref[...].astype(jnp.bfloat16), w1_ref[...],
                    preferred_element_type=jnp.float32) + b1_ref[...]
        h_sc[...] = jnp.tanh(h).astype(jnp.bfloat16)

    o_ref[...] = (jnp.dot(h_sc[...], w2_ref[...],
                          preferred_element_type=jnp.float32)
                  + b2_ref[...]).astype(o_ref.dtype)


def clip_project_mlp(x, w1, b1, w2, b2, *, tm=256, tn=512,
                     out_dtype=jnp.bfloat16):
    M, K = x.shape
    Hd = w1.shape[1]
    N = w2.shape[1]
    tm = _pick_tile(M, tm, 8)
    tn = _pick_tile(N, tn, 128)
    return pl.pallas_call(
        _mlp_tanh_kernel,
        out_shape=jax.ShapeDtypeStruct((M, N), out_dtype),
        grid=(M // tm, N // tn),
        in_specs=[
            pl.BlockSpec((tm, K), lambda i, j: (i, 0)),
            pl.BlockSpec((K, Hd), lambda i, j: (0, 0)),
            pl.BlockSpec((1, Hd), lambda i, j: (0, 0)),
            pl.BlockSpec((Hd, tn), lambda i, j: (0, j)),
            pl.BlockSpec((1, tn), lambda i, j: (0, j)),
        ],
        out_specs=pl.BlockSpec((tm, tn), lambda i, j: (i, j)),
        scratch_shapes=[pltpu.VMEM((tm, Hd), jnp.bfloat16)],
        compiler_params=_cparams("parallel", "arbitrary"),
    )(x, w1, b1, w2, b2)


def _ln_matmul_kernel(x_ref, g_ref, bln_ref, w_ref, b_ref, o_ref, xn_sc):
    """LN(x) @ W + b with LayerNorm computed once per row tile (j==0)."""
    @pl.when(pl.program_id(1) == 0)
    def _():
        x = x_ref[...].astype(jnp.float32)
        xn_sc[...] = _ln_f32(x, g_ref[...], bln_ref[...]).astype(jnp.bfloat16)

    o_ref[...] = (jnp.dot(xn_sc[...], w_ref[...],
                          preferred_element_type=jnp.float32)
                  + b_ref[...]).astype(o_ref.dtype)


def ln_linear(x, g, bln, w, b, *, tm=256, tn=512, out_dtype=jnp.bfloat16):
    M, K = x.shape
    N = w.shape[1]
    tm = _pick_tile(M, tm, 8)
    tn = _pick_tile(N, tn, 128)
    return pl.pallas_call(
        _ln_matmul_kernel,
        out_shape=jax.ShapeDtypeStruct((M, N), out_dtype),
        grid=(M // tm, N // tn),
        in_specs=[
            pl.BlockSpec((tm, K), lambda i, j: (i, 0)),
            pl.BlockSpec((1, K), lambda i, j: (0, 0)),
            pl.BlockSpec((1, K), lambda i, j: (0, 0)),
            pl.BlockSpec((K, tn), lambda i, j: (0, j)),
            pl.BlockSpec((1, tn), lambda i, j: (0, j)),
        ],
        out_specs=pl.BlockSpec((tm, tn), lambda i, j: (i, j)),
        scratch_shapes=[pltpu.VMEM((tm, K), jnp.bfloat16)],
        compiler_params=_cparams("parallel", "arbitrary"),
    )(x, g, bln, w, b)


def _matmul_residual_kernel(a_ref, w_ref, b_ref, r_ref, o_ref):
    """Residual fused into matmul epilogue: r + a @ W + b."""
    o_ref[...] = (r_ref[...].astype(jnp.float32)
                  + jnp.dot(a_ref[...].astype(jnp.bfloat16), w_ref[...],
                            preferred_element_type=jnp.float32)
                  + b_ref[...]).astype(o_ref.dtype)


def matmul_residual(a, w, b, r, *, tm=256, tn=512, out_dtype=jnp.bfloat16):
    M, K = a.shape
    N = w.shape[1]
    tm = _pick_tile(M, tm, 8)
    tn = _pick_tile(N, tn, 128)
    return pl.pallas_call(
        _matmul_residual_kernel,
        out_shape=jax.ShapeDtypeStruct((M, N), out_dtype),
        grid=(M // tm, N // tn),
        in_specs=[
            pl.BlockSpec((tm, K), lambda i, j: (i, 0)),
            pl.BlockSpec((K, tn), lambda i, j: (0, j)),
            pl.BlockSpec((1, tn), lambda i, j: (0, j)),
            pl.BlockSpec((tm, tn), lambda i, j: (i, j)),
        ],
        out_specs=pl.BlockSpec((tm, tn), lambda i, j: (i, j)),
        compiler_params=_cparams("parallel", "parallel"),
    )(a, w, b, r)


def _ln_mlp_residual_kernel(x_ref, g_ref, bln_ref, w1_ref, b1_ref,
                            w2_ref, b2_ref, o_ref, xn_sc, acc_sc):
    """GPT-2 block MLP, Dff-tiled: x + gelu_new(LN(x) @ Wfc + bfc) @ Wproj + bproj.
    Only a (D, tff)/(tff, D) weight slice is VMEM-resident per step (v7x-safe);
    LN computed once per row tile; output accumulated in f32 scratch."""
    j = pl.program_id(1)

    @pl.when(j == 0)
    def _():
        x = x_ref[...].astype(jnp.float32)
        xn_sc[...] = _ln_f32(x, g_ref[...], bln_ref[...]).astype(jnp.bfloat16)
        acc_sc[...] = jnp.zeros(acc_sc.shape, jnp.float32)

    h = jnp.dot(xn_sc[...], w1_ref[...],
                preferred_element_type=jnp.float32) + b1_ref[...]
    c = jnp.float32(0.7978845608028654)  # sqrt(2/pi)
    h = 0.5 * h * (1.0 + jnp.tanh(c * (h + 0.044715 * h * h * h)))  # gelu_new
    # TODO(synk): on v5e the f32 tanh runs on the single EUP; shrink tm if EUP-bound.
    acc_sc[...] += jnp.dot(h.astype(jnp.bfloat16), w2_ref[...],
                           preferred_element_type=jnp.float32)

    @pl.when(j == pl.num_programs(1) - 1)
    def _():
        o_ref[...] = (x_ref[...].astype(jnp.float32) + acc_sc[...]
                      + b2_ref[...]).astype(o_ref.dtype)


def ln_mlp_residual(x, g, bln, w1, b1, w2, b2, *, tm=256, tff=512,
                    out_dtype=jnp.bfloat16):
    M, D = x.shape
    Dff = w1.shape[1]
    tm = _pick_tile(M, tm, 8)
    tff = _pick_tile(Dff, tff, 128)
    return pl.pallas_call(
        _ln_mlp_residual_kernel,
        out_shape=jax.ShapeDtypeStruct((M, D), out_dtype),
        grid=(M // tm, Dff // tff),
        in_specs=[
            pl.BlockSpec((tm, D), lambda i, j: (i, 0)),
            pl.BlockSpec((1, D), lambda i, j: (0, 0)),
            pl.BlockSpec((1, D), lambda i, j: (0, 0)),
            pl.BlockSpec((D, tff), lambda i, j: (0, j)),
            pl.BlockSpec((1, tff), lambda i, j: (0, j)),
            pl.BlockSpec((tff, D), lambda i, j: (j, 0)),
            pl.BlockSpec((1, D), lambda i, j: (0, 0)),
        ],
        out_specs=pl.BlockSpec((tm, D), lambda i, j: (i, 0)),
        scratch_shapes=[pltpu.VMEM((tm, D), jnp.bfloat16),
                        pltpu.VMEM((tm, D), jnp.float32)],
        compiler_params=_cparams("parallel", "arbitrary"),
    )(x, g, bln, w1, b1, w2, b2)


def _ln_lmhead_kernel(x_ref, g_ref, bln_ref, wt_ref, o_ref, xn_sc):
    """Final LN fused into the tied LM head.  wt_ref is a pre-transposed bf16 wte^T
    block (D, tn) (k-major RHS, no per-tile transpose); LN computed once per row tile."""
    @pl.when(pl.program_id(1) == 0)
    def _():
        x = x_ref[...].astype(jnp.float32)
        xn_sc[...] = _ln_f32(x, g_ref[...], bln_ref[...]).astype(jnp.bfloat16)

    o_ref[...] = jnp.dot(xn_sc[...], wt_ref[...],
                         preferred_element_type=jnp.float32).astype(o_ref.dtype)


def ln_lmhead(x, g, bln, wte_t, *, tm=256, tn=512):
    M, D = x.shape
    Vp = wte_t.shape[1]
    tm = _pick_tile(M, tm, 8)
    tn = _pick_tile(Vp, tn, 128)
    return pl.pallas_call(
        _ln_lmhead_kernel,
        out_shape=jax.ShapeDtypeStruct((M, Vp), jnp.float32),
        grid=(M // tm, Vp // tn),
        in_specs=[
            pl.BlockSpec((tm, D), lambda i, j: (i, 0)),
            pl.BlockSpec((1, D), lambda i, j: (0, 0)),
            pl.BlockSpec((1, D), lambda i, j: (0, 0)),
            pl.BlockSpec((D, tn), lambda i, j: (0, j)),
        ],
        out_specs=pl.BlockSpec((tm, tn), lambda i, j: (i, j)),
        scratch_shapes=[pltpu.VMEM((tm, D), jnp.bfloat16)],
        compiler_params=_cparams("parallel", "arbitrary"),
    )(x, g, bln, wte_t)


def _flash_attn_kernel(q_ref, k_ref, v_ref, kmask_ref, o_ref,
                       m_sc, l_sc, acc_sc, *, scale):
    """Flash-style causal attention; ALL heads of one batch element per grid step
    (head-batched einsums), key-tiled along grid axis 1 with online softmax."""
    kv = pl.program_id(1)

    @pl.when(kv == 0)
    def _():
        m_sc[...] = jnp.full(m_sc.shape, -1e30, jnp.float32)
        l_sc[...] = jnp.zeros(l_sc.shape, jnp.float32)
        acc_sc[...] = jnp.zeros(acc_sc.shape, jnp.float32)

    q = q_ref[0].astype(jnp.bfloat16)   # (H, S, dh)
    k = k_ref[0].astype(jnp.bfloat16)   # (H, tk, dh)
    v = v_ref[0].astype(jnp.bfloat16)   # (H, tk, dh)

    s = jnp.einsum('hqd,hkd->hqk', q, k,
                   preferred_element_type=jnp.float32) * scale      # (H, S, tk)
    _, S, tk = s.shape
    row = lax.broadcasted_iota(jnp.int32, (1, S, tk), 1)
    col = lax.broadcasted_iota(jnp.int32, (1, S, tk), 2) + kv * tk
    valid = (col <= row) & (kmask_ref[0, 0] > 0.5)                  # causal & key-pad
    s = jnp.where(valid, s, jnp.float32(-1e30))

    m_prev = m_sc[...]                                              # (H, S, 1)
    m_new = jnp.maximum(m_prev, jnp.max(s, axis=-1, keepdims=True))
    alpha = jnp.exp(m_prev - m_new)
    p = jnp.where(valid, jnp.exp(s - m_new), 0.0)                   # zero masked weights
    l_sc[...] = alpha * l_sc[...] + jnp.sum(p, axis=-1, keepdims=True)
    acc_sc[...] = alpha * acc_sc[...] + jnp.einsum(
        'hqk,hkd->hqd', p.astype(jnp.bfloat16), v,
        preferred_element_type=jnp.float32)
    m_sc[...] = m_new

    @pl.when(kv == pl.num_programs(1) - 1)
    def _():
        o_ref[0] = (acc_sc[...] *
                    pl.reciprocal(l_sc[...], approx=True)).astype(o_ref.dtype)


def flash_attention(q, k, v, key_mask, *, tk=256, out_dtype=jnp.bfloat16):
    """q,k,v: (B, H, S, dh); key_mask: (B, S) of 0/1 (1 = attend)."""
    B, H, S, dh = q.shape
    tk = _pick_tile(S, tk, 8)
    n_kv = S // tk
    kmask4 = key_mask.astype(jnp.float32).reshape(B, n_kv, 1, tk)
    scale = 1.0 / float(dh) ** 0.5
    kern = functools.partial(_flash_attn_kernel, scale=scale)
    return pl.pallas_call(
        kern,
        out_shape=jax.ShapeDtypeStruct((B, H, S, dh), out_dtype),
        grid=(B, n_kv),
        in_specs=[
            pl.BlockSpec((1, H, S, dh), lambda b, j: (b, 0, 0, 0)),
            pl.BlockSpec((1, H, tk, dh), lambda b, j: (b, 0, j, 0)),
            pl.BlockSpec((1, H, tk, dh), lambda b, j: (b, 0, j, 0)),
            pl.BlockSpec((1, 1, 1, tk), lambda b, j: (b, j, 0, 0)),
        ],
        out_specs=pl.BlockSpec((1, H, S, dh), lambda b, j: (b, 0, 0, 0)),
        scratch_shapes=[
            pltpu.VMEM((H, S, 1), jnp.float32),
            pltpu.VMEM((H, S, 1), jnp.float32),
            pltpu.VMEM((H, S, dh), jnp.float32),
        ],
        compiler_params=_cparams("parallel", "arbitrary"),
    )(q, k, v, kmask4)


# ----------------------------------------------------------------------------
# Parameters (deterministic synthetic init — no pretrained checkpoints)
# ----------------------------------------------------------------------------
def init_params(key, *, vocab, n_ctx, n_embd, n_head, n_layer, clip_size, prefix_len):
    keys = iter(jax.random.split(key, 16 + 8 * n_layer))

    def nrm(shape, s=0.02):
        return (s * jax.random.normal(next(keys), shape)).astype(jnp.float32)

    D = n_embd
    hidden = D * prefix_len // 2
    params = dict(
        n_head=n_head, prefix_len=prefix_len,
        wte=nrm((vocab, D)), wpe=nrm((n_ctx, D), 0.01),
        lnf_g=jnp.ones((D,), jnp.float32), lnf_b=jnp.zeros((D,), jnp.float32),
        # clip_project MLP: clip_size -> D*prefix_len//2 -> D*prefix_len
        mlp_w1=nrm((clip_size, hidden)), mlp_b1=jnp.zeros((hidden,), jnp.float32),
        mlp_w2=nrm((hidden, D * prefix_len)),
        mlp_b2=jnp.zeros((D * prefix_len,), jnp.float32),
        blocks=[],
    )
    for _ in range(n_layer):
        params['blocks'].append(dict(
            ln1_g=jnp.ones((D,), jnp.float32), ln1_b=jnp.zeros((D,), jnp.float32),
            attn_w=nrm((D, 3 * D)), attn_b=jnp.zeros((3 * D,), jnp.float32),
            proj_w=nrm((D, D)), proj_b=jnp.zeros((D,), jnp.float32),
            ln2_g=jnp.ones((D,), jnp.float32), ln2_b=jnp.zeros((D,), jnp.float32),
            fc_w=nrm((D, 4 * D)), fc_b=jnp.zeros((4 * D,), jnp.float32),
            mproj_w=nrm((4 * D, D)), mproj_b=jnp.zeros((D,), jnp.float32),
        ))
    return params


def prepare_params(params):
    """Hoist per-forward work out of the hot path (done ONCE): bf16 weight copies,
    (1, N) f32 bias/LN rows, and a vocab-padded, pre-transposed bf16 wte^T for the
    LM head (no per-forward casts / pads / transposes)."""
    bf = jnp.bfloat16
    V, D = params['wte'].shape
    Vp = ((V + 127) // 128) * 128
    wte_pad = params['wte'] if Vp == V else jnp.pad(params['wte'], ((0, Vp - V), (0, 0)))

    def row(v):
        return v[None, :].astype(jnp.float32)

    dev = dict(
        n_head=params['n_head'], prefix_len=params['prefix_len'], vocab=V,
        wte=params['wte'].astype(bf),                       # embedding table (gather)
        wte_t=jnp.asarray(wte_pad.T).astype(bf),            # (D, Vp) LM-head RHS
        wpe=params['wpe'].astype(bf),
        lnf_g=row(params['lnf_g']), lnf_b=row(params['lnf_b']),
        mlp_w1=params['mlp_w1'].astype(bf), mlp_b1=row(params['mlp_b1']),
        mlp_w2=params['mlp_w2'].astype(bf), mlp_b2=row(params['mlp_b2']),
        blocks=[],
    )
    for blk in params['blocks']:
        dev['blocks'].append(dict(
            ln1_g=row(blk['ln1_g']), ln1_b=row(blk['ln1_b']),
            attn_w=blk['attn_w'].astype(bf), attn_b=row(blk['attn_b']),
            proj_w=blk['proj_w'].astype(bf), proj_b=row(blk['proj_b']),
            ln2_g=row(blk['ln2_g']), ln2_b=row(blk['ln2_b']),
            fc_w=blk['fc_w'].astype(bf), fc_b=row(blk['fc_b']),
            mproj_w=blk['mproj_w'].astype(bf), mproj_b=row(blk['mproj_b']),
        ))
    return dev


# ----------------------------------------------------------------------------
# Forward pass (== ClipCaptionModel.forward, mapping_type='MLP', eval mode)
# ----------------------------------------------------------------------------
DEFAULT_TILES = dict(tm=256, tn=512, attn_tk=256, tff=512)


def clip_caption_forward(params, clip_embeds, caption_ids, mask, tiles=None):
    tiles = {**DEFAULT_TILES, **(tiles or {})}
    wte = params['wte']
    B = clip_embeds.shape[0]
    D = wte.shape[1]
    V = params['vocab']
    prefix_len = params['prefix_len']
    n_head = params['n_head']
    dh = D // n_head

    # caption_embeds = gpt2.transformer.wte(caption_ids)   (gather -- glue)
    caption_embeds = jnp.take(wte, caption_ids, axis=0)                  # (B, L, D) bf16

    # prefix_embeds = clip_project(clip_embeds).view(-1, prefix_len, D)
    prefix = clip_project_mlp(clip_embeds, params['mlp_w1'], params['mlp_b1'],
                              params['mlp_w2'], params['mlp_b2'],
                              tm=tiles['tm'], tn=tiles['tn'])
    prefix_embeds = prefix.reshape(B, prefix_len, D)

    h = jnp.concatenate([prefix_embeds, caption_embeds], axis=1)         # (B, S, D)
    S = h.shape[1]

    # TODO(synk): the original passes a caption-length attention_mask to HF GPT-2 even
    # though the concatenated sequence is longer; we prepend ones for the prefix slots.
    key_mask = jnp.concatenate(
        [jnp.ones((B, prefix_len), jnp.float32), mask.astype(jnp.float32)], axis=1)

    # GPT-2 transformer (dropout omitted: eval semantics)
    h = h + params['wpe'][:S][None, :, :]
    h2 = h.reshape(B * S, D)                                             # bf16 residual stream

    for blk in params['blocks']:
        # fused LN1 -> qkv projection (LN computed once per row tile)
        qkv = ln_linear(h2, blk['ln1_g'], blk['ln1_b'], blk['attn_w'], blk['attn_b'],
                        tm=tiles['tm'], tn=tiles['tn'])                  # (B*S, 3D) bf16
        # TODO(synk): head split/merge transposes stay in XLA; folding them into the
        # qkv/proj BlockSpecs would need dh-wide (sub-128-lane) blocks.
        qkv = qkv.reshape(B, S, 3, n_head, dh).transpose(2, 0, 3, 1, 4)  # (3,B,H,S,dh)
        q, k, v = qkv[0], qkv[1], qkv[2]

        a = flash_attention(q, k, v, key_mask, tk=tiles['attn_tk'])      # (B,H,S,dh) bf16
        a = a.transpose(0, 2, 1, 3).reshape(B * S, D)

        # attn output projection with fused residual add
        h2 = matmul_residual(a, blk['proj_w'], blk['proj_b'], h2,
                             tm=tiles['tm'], tn=tiles['tn'])
        # fused LN2 -> MLP (Dff-tiled, accumulator) -> residual add
        h2 = ln_mlp_residual(h2, blk['ln2_g'], blk['ln2_b'],
                             blk['fc_w'], blk['fc_b'],
                             blk['mproj_w'], blk['mproj_b'],
                             tm=tiles['tm'], tff=tiles['tff'])

    # fused final LN + tied LM head against pre-transposed bf16 wte^T
    logits = ln_lmhead(h2, params['lnf_g'], params['lnf_b'], params['wte_t'],
                       tm=tiles['tm'], tn=tiles['tn'])
    Vp = logits.shape[1]
    logits = logits.reshape(B, S, Vp)
    if Vp != V:
        # TODO(synk): production should keep padded logits and mask in the loss to avoid
        # materializing this sliced copy.
        logits = logits[..., :V]
    return logits


# ----------------------------------------------------------------------------
if __name__ == "__main__":
    # Small synthetic config consistent with the module's shapes.
    B, clip_size, max_len = 2, 64, 12
    n_embd, n_head, n_layer, vocab, prefix_len = 128, 2, 2, 384, 4
    n_ctx = 32

    master = init_params(jax.random.PRNGKey(0), vocab=vocab, n_ctx=n_ctx,
                         n_embd=n_embd, n_head=n_head, n_layer=n_layer,
                         clip_size=clip_size, prefix_len=prefix_len)
    params = prepare_params(master)   # bf16 weights / padded wte^T hoisted once

    kc, kid = jax.random.split(jax.random.PRNGKey(0), 2)
    clip_embeds = jax.random.normal(kc, (B, clip_size), jnp.float32)
    caption_ids = jax.random.randint(kid, (B, max_len), 0, vocab)
    # Second example has three padding positions at the end.
    mask = (jnp.arange(max_len)[None, :] <
            jnp.array([[max_len], [max_len - 3]])).astype(jnp.float32)

    # Small tiles so the demo exercises multi-block grids (M tiling, N tiling,
    # Dff accumulation, vocab tiling and the multi-key-tile flash path).
    demo_tiles = dict(tm=8, tn=128, attn_tk=8, tff=128)

    logits = clip_caption_forward(params, clip_embeds, caption_ids, mask,
                                  tiles=demo_tiles)
    logits = jax.block_until_ready(logits)

    assert logits.shape == (B, prefix_len + max_len, vocab), logits.shape
    assert logits.dtype == jnp.float32
    assert bool(jnp.all(jnp.isfinite(logits)))
    print("KERNEL_OK")
</pallas_src>

<mosaic_0001>
module attributes {stable_mosaic.version = 11 : i64} {
  func.func @_mlp_tanh_kernel(%arg0: i32, %arg1: i32, %arg2: memref<2x64xf32, #tpu.memory_space<vmem>>, %arg3: memref<64x256xbf16, #tpu.memory_space<vmem>>, %arg4: memref<1x256xf32, #tpu.memory_space<vmem>>, %arg5: memref<256x128xbf16, #tpu.memory_space<vmem>>, %arg6: memref<1x128xf32, #tpu.memory_space<vmem>>, %arg7: memref<2x128xbf16, #tpu.memory_space<vmem>>, %arg8: memref<2x256xbf16, #tpu.memory_space<vmem>>) attributes {dimension_semantics = [#tpu.dimension_semantics<parallel>, #tpu.dimension_semantics<arbitrary>], iteration_bounds = array<i64: 1, 4>, scalar_prefetch = 0 : i64, scratch_operands = 1 : i64, tpu.core_type = #tpu.core_type<tc>, window_params = [{transform_indices = @transform_0, window_bounds = array<i64: 2, 64>}, {pipeline_mode = #tpu.pipeline_mode<synchronous>, transform_indices = @transform_1, window_bounds = array<i64: 64, 256>}, {pipeline_mode = #tpu.pipeline_mode<synchronous>, transform_indices = @transform_2, window_bounds = array<i64: 1, 256>}, {transform_indices = @transform_3, window_bounds = array<i64: 256, 128>}, {transform_indices = @transform_4, window_bounds = array<i64: 1, 128>}, {transform_indices = @transform_5, window_bounds = array<i64: 2, 128>}]} {
    %c0_i32 = arith.constant 0 : i32
    %0 = arith.cmpi eq, %arg1, %c0_i32 : i32
    %1 = arith.extui %0 : i1 to i32
    %c0_i32_0 = arith.constant 0 : i32
    %2 = arith.cmpi ne, %1, %c0_i32_0 : i32
    scf.if %2 {
      %c0_8 = arith.constant 0 : index
      %c0_9 = arith.constant 0 : index
      %11 = vector.load %arg2[%c0_8, %c0_9] : memref<2x64xf32, #tpu.memory_space<vmem>>, vector<2x64xf32>
      %12 = arith.truncf %11 : vector<2x64xf32> to vector<2x64xbf16>
      %c0_10 = arith.constant 0 : index
      %c0_11 = arith.constant 0 : index
      %13 = vector.load %arg3[%c0_10, %c0_11] : memref<64x256xbf16, #tpu.memory_space<vmem>>, vector<64x256xbf16>
      %cst_12 = arith.constant dense<0.000000e+00> : vector<2x256xf32>
      %14 = tpu.matmul %12, %13, %cst_12 {dimension_numbers = #tpu.dot_dimension_numbers<[1], [0], [0], [1], [0, 0, 1, 1], [], []>} : vector<2x64xbf16>, vector<64x256xbf16>, vector<2x256xf32> -> vector<2x256xf32>
      %c0_13 = arith.constant 0 : index
      %c0_14 = arith.constant 0 : index
      %15 = vector.load %arg4[%c0_13, %c0_14] : memref<1x256xf32, #tpu.memory_space<vmem>>, vector<1x256xf32>
      %16 = vector.broadcast %15 : vector<1x256xf32> to vector<2x256xf32>
      %17 = arith.addf %14, %16 : vector<2x256xf32>
      %18 = math.tanh %17 : vector<2x256xf32>
      %19 = arith.truncf %18 : vector<2x256xf32> to vector<2x256xbf16>
      %c0_15 = arith.constant 0 : index
      %c0_16 = arith.constant 0 : index
      %20 = vector.load %arg8[%c0_15, %c0_16] : memref<2x256xbf16, #tpu.memory_space<vmem>>, vector<2x256xbf16>
      tpu.vector_store %arg8[%c0_15, %c0_16], %19 {strides = array<i32>} : memref<2x256xbf16, #tpu.memory_space<vmem>>, vector<2x256xbf16>,
    } else {
    }
    %c0 = arith.constant 0 : index
    %c0_1 = arith.constant 0 : index
    %3 = vector.load %arg8[%c0, %c0_1] : memref<2x256xbf16, #tpu.memory_space<vmem>>, vector<2x256xbf16>
    %c0_2 = arith.constant 0 : index
    %c0_3 = arith.constant 0 : index
    %4 = vector.load %arg5[%c0_2, %c0_3] : memref<256x128xbf16, #tpu.memory_space<vmem>>, vector<256x128xbf16>
    %cst = arith.constant dense<0.000000e+00> : vector<2x128xf32>
    %5 = tpu.matmul %3, %4, %cst {dimension_numbers = #tpu.dot_dimension_numbers<[1], [0], [0], [1], [0, 0, 1, 1], [], []>} : vector<2x256xbf16>, vector<256x128xbf16>, vector<2x128xf32> -> vector<2x128xf32>
    %c0_4 = arith.constant 0 : index
    %c0_5 = arith.constant 0 : index
    %6 = vector.load %arg6[%c0_4, %c0_5] : memref<1x128xf32, #tpu.memory_space<vmem>>, vector<1x128xf32>
    %7 = vector.broadcast %6 : vector<1x128xf32> to vector<2x128xf32>
    %8 = arith.addf %5, %7 : vector<2x128xf32>
    %9 = arith.truncf %8 : vector<2x128xf32> to vector<2x128xbf16>
    %c0_6 = arith.constant 0 : index
    %c0_7 = arith.constant 0 : index
    %10 = vector.load %arg7[%c0_6, %c0_7] : memref<2x128xbf16, #tpu.memory_space<vmem>>, vector<2x128xbf16>
    tpu.vector_store %arg7[%c0_6, %c0_7], %9 {strides = array<i32>} : memref<2x128xbf16, #tpu.memory_space<vmem>>, vector<2x128xbf16>,
    return
  }
  func.func @transform_0(%arg0: i32, %arg1: i32) -> (i32, i32) {
    %c0_i32 = arith.constant 0 : i32
    %c0_i32_0 = arith.constant 0 : i32
    return %arg0, %c0_i32 : i32, i32
  }
  func.func @transform_1(%arg0: i32, %arg1: i32) -> (i32, i32) {
    %c0_i32 = arith.constant 0 : i32
    %c0_i32_0 = arith.constant 0 : i32
    %c0_i32_1 = arith.constant 0 : i32
    return %c0_i32, %c0_i32_0 : i32, i32
  }
  func.func @transform_2(%arg0: i32, %arg1: i32) -> (i32, i32) {
    %c0_i32 = arith.constant 0 : i32
    %c0_i32_0 = arith.constant 0 : i32
    %c0_i32_1 = arith.constant 0 : i32
    return %c0_i32, %c0_i32_0 : i32, i32
  }
  func.func @transform_3(%arg0: i32, %arg1: i32) -> (i32, i32) {
    %c0_i32 = arith.constant 0 : i32
    %c0_i32_0 = arith.constant 0 : i32
    return %c0_i32, %arg1 : i32, i32
  }
  func.func @transform_4(%arg0: i32, %arg1: i32) -> (i32, i32) {
    %c0_i32 = arith.constant 0 : i32
    %c0_i32_0 = arith.constant 0 : i32
    return %c0_i32, %arg1 : i32, i32
  }
  func.func @transform_5(%arg0: i32, %arg1: i32) -> (i32, i32) {
    %c0_i32 = arith.constant 0 : i32
    return %arg0, %arg1 : i32, i32
  }
}

</mosaic_0001>

<bundles_post_ra>
// kernel: tpu_custom_call.1
= control target key start
LH: loop header
LB: loop body
LE: loop exit
PB: predicated region body
PF: predicated region fallthrough
CT: control target
= control target key end

     0   :  { %s1623_s0 = inlined_call_operand.hbm [shape: f32[2,64], index: 0, kind: input, shape index: {}]   ;;  %s1624_s1 = inlined_call_operand.hbm [shape: bf16[64,256], index: 1, kind: input, shape index: {}]   ;;  %s1625_s2 = inlined_call_operand.hbm [shape: f32[1,256], index: 2, kind: input, shape index: {}]   ;;  %s1626_s3 = inlined_call_operand.hbm [shape: bf16[256,512], index: 3, kind: input, shape index: {}]   ;;  %s1627_s4 = inlined_call_operand.hbm [shape: f32[1,512], index: 4, kind: input, shape index: {}]   ;;  %s1628_s5 = inlined_call_operand.hbm [shape: bf16[2,512], index: 5, kind: output, shape index: {}]  }
   0x1   :  { %1645 = sst [smem:[#allocation22_spill]] %s1624_s1 }
   0x2   :  { %1646 = sst [smem:[#allocation23_spill]] %s1626_s3 }
   0x3   :  { %1647 = sst [smem:[#allocation24_spill]] %s1628_s5 }
   0x4   :  { %10 = vsyncpa [#allocation4], 0 }
   0x5   :  { %11 = vsyncpa [#allocation7], 0 }
   0x6   :  { %12 = vsyncpa [#allocation10], 0 }
   0x7   :  { %14 = vsyncpa [#allocation10 + $0x1], 0 }
   0x8   :  { %15 = vsyncpa [#allocation5], 0 }
   0x9   :  { %17 = vsyncpa [#allocation5 + $0x1], 0  ;;  %s1300_s18 = smov 0   ;;  %s1302_s19 = smov 0  }
   0xa   :  { %s1304_s20 = smov 0   ;;  %s1306_s21 = smov 0  }
   0xb   :  { %s1308_s22 = smov 0   ;;  %s1310_s23 = smov 0  }
   0xc LB: > { %1648 = sst [smem:[#allocation17_spill]] %s1234_s18  ;;  %s1331_s24 = sadd.s32 4294967295, %s1254_s23   ;;  %s1254_s23 = sphi %s1310_s23, %s23_s23   ;;  %s1250_s22 = sphi %s1308_s22, %s1689_s22   ;;  %s1246_s21 = sphi %s1306_s21, %s1688_s21   ;;  %s1242_s20 = sphi %s1304_s20, %s1687_s20   ;;  %s1238_s19 = sphi %s1302_s19, %s1686_s19   ;;  %s1234_s18 = sphi %s1300_s18, %s1685_s18  }
   0xd   : > { %1649 = sst [smem:[#allocation18_spill]] %s1246_s21  ;;  %s813_s25 = sadd.s32 4294967294, %s1254_s23  }
   0xe   : > { %p117_p0 = scmp.ne.s32.totalorder %s1242_s20, %s1238_s19  ;;  %p118_p1 = scmp.eq.s32.totalorder %s1254_s23, 0 }
   0xf   : > { %p123_p2 = scmp.ne.s32.totalorder %s1238_s19, %s1234_s18  ;;  %p1629_p3 = scmp.eq.s32.totalorder %s1331_s24, 0 }
  0x10   : > { %p175_p4 = scmp.eq.s32.totalorder %s1331_s24, 3  ;;  %p1342_p5 = por %p118_p1, %p117_p0 }
  0x11   : > { %p181_p6 = scmp.eq.s32.totalorder %s813_s25, 3  ;;  %p1348_p7 = por %p1629_p3, %p123_p2 }
  0x12   : > { %p1352_p8 = por %p175_p4, %p117_p0  ;;  %p814_p10 = scmp.ge.s32.totalorder %s1254_s23, 1 }
  0x13   : > { %s1651_s28 = scalar_select %p1348_p7, 1, 0 }
  0x14   : > { %s1652_s29 = scalar_select %p1352_p8, 1, 0 }
  0x15   : > { %p1356_p9 = por %p181_p6, %p123_p2  ;;  %p188_p11 = scmp.lt.s32.totalorder %s1254_s23, 5 }
  0x16   : > { %1653 = sst [smem:[#allocation19_spill]] %s1652_s29  ;;  %s1256_s7 = smov [#allocation6]  }
  0x17   : > { %s1654_s30 = scalar_select %p1356_p9, 1, 0 }
  0x18   : > { %p1362_p12 = pnand %p814_p10, %p188_p11  ;;  %s213_s8 = sshll.u32 %s1256_s7, 4  ;;  %s1366_s8 = int_to_ptr.vmem [resolvable:$true] %s213_s8 }
  0x19   : > { %1655 = sst [smem:[#allocation20_spill]] %s1654_s30  ;;  %p924_p0 = scmp.lt.s32.totalorder %s1254_s23, 4 }
  0x1a   : > { %s1656_s6 = scalar_select %p1362_p12, 1, 0 }
  0x1b   : > { %p900_p13 = pneg %p1362_p12  ;;  %p1379_p2 = pnand %p924_p0, %p1342_p5 }
  0x1c   : > { %s32_s11 = sadd.s32 1, %s1250_s22  ;;  %s1660_s1 = sld [smem:[#allocation22_spill]] }
  0x1d   : > { %p1373_p1 = pnand %p900_p13, %p1629_p3  ;;  %p1384_p4 = scmp.ge.s32.totalorder %s32_s11, 4 }
  0x1e   : > { %s1658_s10 = scalar_select %p1379_p2, 1, 0 }
  0x1f   : > { %s1657_s9 = scalar_select %p1373_p1, 1, 0 }
  0x20   : > { %p1396_p10 = pneg %p1373_p1 }
  0x22   : > { %s1020_s15 = scalar_lea.hbm %s1660_s1, 1024 }
  0x23   : > { %p1021_p6 = scmp.ne.s32.totalorder %s1660_s1, %s1020_s15  ;;  %p1027_p13 = scmp.lt.u32.totalorder %s1020_s15, %s1660_s1 }
  0x25   : > { %p1023_p5 = pnand %p1396_p10, %p1021_p6 }
  0x27   : > { %p1024_p11 = pneg %p1023_p5 }
  0x29   : > { %p1029_p0 = pnand %p1027_p13, %p1024_p11 }
  0x2b   : > { %1032 = shalt.err (!%p1029_p0)
}
  0x2c   : > { %s1033_s13 = scalar_lea.vmem %s1366_s8, 1024  ;;  %p1041_p7 = scmp.lt.s32.totalorder %s1366_s8, %s1366_s8 }
  0x2d   : > { %p1034_p3 = scmp.ne.s32.totalorder %s1366_s8, %s1033_s13  ;;  %p1042_p12 = scmp.lt.s32.totalorder %s1033_s13, %s1033_s13 }
  0x2f   : > { %p1036_p9 = pnand %p1034_p3, %p1396_p10  ;;  %p1043_p6 = por %p1042_p12, %p1041_p7 }
  0x31   : > { %p1037_p8 = pneg %p1036_p9 }
  0x33   : > { %p1044_p5 = pnand %p1043_p6, %p1037_p8 }
  0x35   : > { %1047 = shalt.err (!%p1044_p5)
}
  0x36   : > { %s1257_s14 = smov 128   ;;  %s1258_s15 = smov 8  }
  0x37   : > { %906 = dma.hbm_to_vmem [thread:$0]  (!%p1373_p1), %s1660_s1, 1024, %s1366_s8, [#allocation7], %s1257_s14, %s1257_s14, %s1258_s15  }
  0x38   : > { %s238_s27 = sand.u32 1, %s1254_s23   ;;  %s1691_s11 = smov (%p1384_p4, %s32_s11), 0 }
  0x39   : > { %1662 = sst [smem:[#allocation21_spill]] %s1691_s11  ;;  %s1640_s7 = sand.u32 1, %s1242_s20  }
  0x3a   : > { %s107_s13 = ssub.s32 %s1250_s22, %s1691_s11  ;;  %s819_s26 = sshll.u32 %s1640_s7, 7 }
  0x3b   : > { %p108_p3 = scmp.eq.s32.totalorder %s107_s13, 0  ;;  %s820_s30 = sshll.u32 %s1250_s22, 6 }
  0x3c   : > { %s242_s18 = scalar_lea.vmem [#allocation9], %s819_s26  ;;  %s1663_s29 = sadd.s32 1, %s1242_s20 }
  0x3d   : > { %s248_s5 = sshll.u32 %s242_s18, 4  ;;  %s1664_s3 = sld [smem:[#allocation23_spill]]  ;;  %s1438_s5 = int_to_ptr.vmem [resolvable:$true] %s248_s5 }
  0x3e   : > { %s1431_s21 = scalar_select %p108_p3, %s1242_s20, %s1663_s29  }
  0x3f   : > { %s1440_s12 = scalar_lea.sflag [#allocation10], %s238_s27  ;;  %p1642_p8 = pneg %p1379_p2 }
  0x43   : > { %s1436_s14 = scalar_lea.hbm %s1664_s3, %s820_s30  ;;  %s1053_s29 = scalar_lea.hbm %s1664_s3, 8192 }
  0x44   : > { %s1048_s15 = scalar_lea.hbm %s1436_s14, 2048  ;;  %p1054_p4 = scmp.lt.u32.totalorder %s1436_s14, %s1664_s3 }
  0x45   : > { %p1049_p7 = scmp.ne.s32.totalorder %s1436_s14, %s1048_s15  ;;  %p1055_p11 = scmp.lt.u32.totalorder %s1053_s29, %s1048_s15 }
  0x46   : > { %p1057_p0 = scmp.lt.u32.totalorder %s1048_s15, %s1436_s14 }
  0x47   : > { %p1051_p9 = pnand %p1642_p8, %p1049_p7  ;;  %p1056_p13 = por %p1055_p11, %p1054_p4 }
  0x49   : > { %p1052_p12 = pneg %p1051_p9  ;;  %p1058_p6 = por %p1057_p0, %p1056_p13 }
  0x4b   : > { %p1059_p5 = pnand %p1058_p6, %p1052_p12 }
  0x4d   : > { %1062 = shalt.err (!%p1059_p5)
}
  0x4e   : > { %s1063_s27 = scalar_lea.vmem %s1438_s5, 2048  ;;  %s1259_s13 = smov [#allocation9]  }
  0x4f   : > { %p1064_p3 = scmp.ne.s32.totalorder %s1438_s5, %s1063_s27  ;;  %s1068_s16 = sshll.u32 %s1259_s13, 4  ;;  %s1069_s16 = int_to_ptr.vmem [resolvable:$false] %s1068_s16 }
  0x50   : > { %s1070_s8 = scalar_lea.vmem %s1069_s16, 4096  ;;  %p1071_p1 = scmp.lt.s32.totalorder %s1438_s5, %s1069_s16 }
  0x51   : > { %p1066_p7 = pnand %p1064_p3, %p1642_p8  ;;  %p1072_p4 = scmp.lt.s32.totalorder %s1070_s8, %s1063_s27 }
  0x53   : > { %p1067_p9 = pneg %p1066_p7  ;;  %p1073_p11 = por %p1072_p4, %p1071_p1 }
  0x55   : > { %p1074_p13 = pnand %p1073_p11, %p1067_p9 }
  0x57   : > { %1077 = shalt.err (!%p1074_p13)
}
  0x58   : > { %s1260_s15 = smov 256   ;;  %s1261_s18 = smov 64  }
  0x59   : > { %s1262_s26 = smov 4   ;;  %s1263_s29 = smov [#allocation3]  }
  0x5a   : > { %913 = dma.hbm_to_vmem [thread:$0]  (!%p1379_p2), %s1436_s14, 2048, %s1438_s5, %s1440_s12, %s1260_s15, %s1261_s18, %s1262_s26  }
  0x5b   : > { %s203_s30 = sshll.u32 %s1263_s29, 4  ;;  %s1264_s17 = smov [#allocation8]   ;;  %s204_s30 = int_to_ptr.vmem [resolvable:$true] %s203_s30 }
  0x5c   : > { %s227_s13 = sshll.u32 %s1264_s17, 4  ;;  %s1078_s8 = scalar_lea.hbm %s1623_s0, 32  ;;  %s228_s13 = int_to_ptr.vmem [resolvable:$true] %s227_s13 }
  0x5d   : > { %p1079_p1 = scmp.ne.s32.totalorder %s1623_s0, %s1078_s8  ;;  %p1085_p6 = scmp.lt.u32.totalorder %s1078_s8, %s1623_s0 }
  0x5f   : > { %p1081_p12 = pnand %p1079_p1, %p1396_p10 }
  0x61   : > { %p1082_p0 = pneg %p1081_p12 }
  0x63   : > { %p1087_p5 = pnand %p1085_p6, %p1082_p0 }
  0x65   : > { %1090 = shalt.err (!%p1087_p5)
}
  0x66   : > { %s1091_s5 = scalar_lea.vmem %s204_s30, 32  ;;  %p1099_p4 = scmp.lt.s32.totalorder %s204_s30, %s204_s30 }
  0x67   : > { %p1092_p3 = scmp.ne.s32.totalorder %s204_s30, %s1091_s5  ;;  %p1100_p11 = scmp.lt.s32.totalorder %s1091_s5, %s1091_s5 }
  0x69   : > { %p1094_p7 = pnand %p1092_p3, %p1396_p10  ;;  %p1101_p13 = por %p1100_p11, %p1099_p4 }
  0x6b   : > { %p1095_p9 = pneg %p1094_p7 }
  0x6d   : > { %p1102_p8 = pnand %p1101_p13, %p1095_p9 }
  0x6f   : > { %1105 = shalt.err (!%p1102_p8)
}
  0x70   : > { %p1665_p1 = scmp.ne.s32.totalorder %s1657_s9, 0  ;;  %s1106_s14 = scalar_lea.hbm %s1625_s2, 32 }
  0x71   : > { %p1107_p12 = scmp.ne.s32.totalorder %s1625_s2, %s1106_s14  ;;  %p1113_p8 = scmp.lt.u32.totalorder %s1106_s14, %s1625_s2 }
  0x72   : > { %903 = dma.hbm_to_vmem [thread:$0]  (!%p1665_p1), %s1623_s0, 32, %s204_s30, [#allocation4]  }
  0x73   : > { %p1109_p0 = pnand %p1107_p12, %p1396_p10 }
  0x75   : > { %p1110_p6 = pneg %p1109_p0 }
  0x77   : > { %p1115_p5 = pnand %p1113_p8, %p1110_p6 }
  0x79   : > { %1118 = shalt.err (!%p1115_p5)
}
  0x7a   : > { %s1119_s17 = scalar_lea.vmem %s228_s13, 32  ;;  %p1127_p4 = scmp.lt.s32.totalorder %s228_s13, %s228_s13 }
  0x7b   : > { %p1120_p3 = scmp.ne.s32.totalorder %s228_s13, %s1119_s17  ;;  %p1128_p11 = scmp.lt.s32.totalorder %s1119_s17, %s1119_s17 }
  0x7d   : > { %p1122_p7 = pnand %p1120_p3, %p1396_p10  ;;  %p1129_p13 = por %p1128_p11, %p1127_p4 }
  0x7f   : > { %p1123_p9 = pneg %p1122_p7 }
  0x81   : > { %p1130_p2 = pnand %p1129_p13, %p1123_p9 }
  0x83   : > { %1133 = shalt.err (!%p1130_p2)
}
  0x84   : > { %909 = dma.hbm_to_vmem [thread:$0]  (!%p1665_p1), %s1625_s2, 32, %s228_s13, [#allocation7]  }
  0x85   : > { %s821_s27 = sshll.u32 %s1250_s22, 4  ;;  %s1666_s8 = sand.u32 1, %s1242_s20  }
  0x86   : > { %s261_s5 = scalar_lea.vmem [#allocation11], %s1666_s8  ;;  %s266_s3 = scalar_lea.hbm %s1627_s4, %s821_s27 }
  0x87   : > { %s268_s25 = sshll.u32 %s261_s5, 4  ;;  %s1134_s11 = scalar_lea.hbm %s266_s3, 16  ;;  %s269_s25 = int_to_ptr.vmem [resolvable:$true] %s268_s25 }
  0x88   : > { %p1135_p2 = scmp.ne.s32.totalorder %s266_s3, %s1134_s11  ;;  %p1667_p10 = scmp.ne.s32.totalorder %s1658_s10, 0 }
  0x89   : > { %s1139_s15 = scalar_lea.hbm %s1627_s4, 64  ;;  %p1140_p1 = scmp.lt.u32.totalorder %s266_s3, %s1627_s4 }
  0x8a   : > { %p1668_p12 = pneg %p1667_p10  ;;  %p1141_p8 = scmp.lt.u32.totalorder %s1139_s15, %s1134_s11 }
  0x8b   : > { %p1143_p3 = scmp.lt.u32.totalorder %s1134_s11, %s266_s3 }
  0x8c   : > { %p1137_p0 = pnand %p1135_p2, %p1668_p12  ;;  %p1142_p5 = por %p1141_p8, %p1140_p1 }
  0x8e   : > { %p1138_p6 = pneg %p1137_p0  ;;  %p1144_p7 = por %p1143_p3, %p1142_p5 }
  0x90   : > { %p1145_p9 = pnand %p1144_p7, %p1138_p6 }
  0x92   : > { %1148 = shalt.err (!%p1145_p9)
}
  0x93   : > { %s1149_s26 = scalar_lea.vmem %s269_s25, 16  ;;  %p1669_p11 = pmov %p1668_p12 }
  0x94   : > { %p1150_p4 = scmp.ne.s32.totalorder %s269_s25, %s1149_s26  ;;  %s1265_s29 = smov [#allocation11]  }
  0x95   : > { %s1154_s17 = sshll.u32 %s1265_s29, 4  ;;  %s1155_s17 = int_to_ptr.vmem [resolvable:$false] %s1154_s17 }
  0x96   : > { %p1152_p13 = pnand %p1150_p4, %p1669_p11  ;;  %s1156_s30 = scalar_lea.vmem %s1155_s17, 32 }
  0x97   : > { %p1157_p12 = scmp.lt.s32.totalorder %s269_s25, %s1155_s17  ;;  %p1158_p0 = scmp.lt.s32.totalorder %s1156_s30, %s1149_s26 }
  0x98   : > { %p1153_p2 = pneg %p1152_p13 }
  0x99   : > { %p1159_p1 = por %p1158_p0, %p1157_p12 }
  0x9b   : > { %p1160_p8 = pnand %p1159_p1, %p1153_p2 }
  0x9d   : > { %1163 = shalt.err (!%p1160_p8)
}
  0x9e   : > { %916 = dma.hbm_to_vmem [thread:$0]  (!%p1667_p10), %s266_s3, 16, %s269_s25, %s1440_s12  }
  0x9f   : > { %p1670_p6 = scmp.ne.s32.totalorder %s1656_s6, 0 }
  0xa0   : > { %p1671_p5 = scmp.eq.s32.totalorder (!%p1670_p6), %s1331_s24, 0 }
  0xa1   : > { %277 = sbr.rel (%p1670_p6) target bundleno = 700 (0x2bc), region = 40 }
  0xa8   : > { %1217 = dma.done.wait (%p1671_p5), [#allocation4], 32   ;;  %p1672_p3 = pmov %p1671_p5 }
  0xaa   : > { %1219 = vsyncadd (%p1672_p3), [#allocation4], 4294967264  ;;  %p1673_p7 = pmov %p1672_p3 }
  0xab   : > { %p1674_p9 = pmov %p1672_p3 }
  0xac   : > { %1221 = dma.done.wait (%p1673_p7), [#allocation7], 1056  }
  0xad   : > { %1223 = vsyncadd (%p1674_p9), [#allocation7], 4294966240  ;;  %s291_s10 = sand.u32 1, %s1331_s24   ;;  %s1537_s12 = sand.u32 1, %s1238_s19  }
  0xae   : > { %s826_s6 = sshll.u32 %s1537_s12, 7  ;;  %s292_s16 = scalar_lea.sflag [#allocation10], %s291_s10 }
  0xaf   : > { %s1540_s27 = scalar_lea.vmem [#allocation9], %s826_s6  ;;  %p1675_p10 = scmp.ne.s32.totalorder %s1651_s28, 0 }
  0xb1   : > { %1225 = dma.done.wait (%p1675_p10), %s292_s16, 2064  }
  0xb2   : > { %1227 = vsyncadd (%p1675_p10), %s292_s16, 4294965232  ;;  %s303_s8 = scalar_lea.vmem [#allocation11], %s1537_s12  ;;  %s332_s5 = scalar_lea.vmem [#allocation12], %s1537_s12 }
  0xb3   : > { %s1676_s25 = sld [smem:[#allocation18_spill]] }
  0xb9   : > { %p827_p4 = scmp.ne.s32.totalorder %s1676_s25, 0 }
  0xba   : > { %v988_v0 = vld [vmem:[#allocation6 + $0x4] ss:$8 sps:$4 sm:$0xff] (!%p827_p4)   ;;  %v990_v1 = vld [vmem:[#allocation6] ss:$8 sps:$4 sm:$0xff] (!%p827_p4)   ;;  %v1266_v2 = vmov (!%p827_p4), 0   ;;  %vm400_vm0 = vcmask (!%p827_p4), 523264   ;;  %v350_v11 = vlaneseq (!%p827_p4) }
  0xbb   : > { %337 = sbr.rel (%p827_p4) target bundleno = 434 (0x1b2), region = 64  ;;  %436 = vmatprep.mubr.bf16.mxu0 (!%p827_p4), %v1266_v2  ;;  %404 = vmatprep.subr.bf16.mxu0 (!%p827_p4), %v988_v0  ;;  %v991_v3 = vld [vmem:[#allocation6 + $0x14] ss:$8 sps:$4 sm:$0xff] (!%p827_p4)   ;;  %v993_v4 = vld [vmem:[#allocation6 + $0x10] ss:$8 sps:$4 sm:$0xff] (!%p827_p4)  }
  0xbc   : > { %405 = vmatpush1.bf16.msra.mxu0 (!%p827_p4), %v990_v1  ;;  %v994_v5 = vld [vmem:[#allocation6 + $0x24] ss:$8 sps:$4 sm:$0xff] (!%p827_p4)   ;;  %v996_v6 = vld [vmem:[#allocation6 + $0x20] ss:$8 sps:$4 sm:$0xff] (!%p827_p4)   ;;  %v997_v7 = vld [vmem:[#allocation6 + $0x34] ss:$8 sps:$4 sm:$0xff] (!%p827_p4)  }
  0xbd   : > { %406 = vmatprep.subr.bf16.mxu0 (!%p827_p4), %v991_v3  ;;  %v999_v8 = vld [vmem:[#allocation6 + $0x30] ss:$8 sps:$4 sm:$0xff] (!%p827_p4)   ;;  %v338_v9 = vld [vmem:[#allocation3] sm:$0x3] (!%p827_p4)  ;;  %v351_v12 = vshrl.u32 (!%p827_p4), %v350_v11, 7 }
  0xbe   : > { %v339_v10 = vpack.c.bf16 (!%p827_p4), %v338_v9, %v338_v9  ;;  %v348_v14 = vld [vmem:[#allocation8] sm:$0x3] (!%p827_p4)  ;;  %v1267_v24 = vmov (!%p827_p4), 1966171168  }
  0xbf   : > { %v352_v13 = vsub.s32 (!%p827_p4), 0, %v351_v12  ;;  %v356_v15 = vsub.s32 (!%p827_p4), 1, %v351_v12  ;;  %v453_v25 = vunpack.c.l.s4 (!%p827_p4), %v1267_v24 }
  0xc0   : > { %407 = vmatpush1.bf16.msra.mxu0 (!%p827_p4), %v993_v4 }
  0xc1   : > { %408 = vmatprep.subr.bf16.mxu0 (!%p827_p4), %v994_v5  ;;  %v353_v16 = vrot.slane (!%p827_p4), %v348_v14, %v352_v13  ;;  %v357_v17 = vrot.slane (!%p827_p4), %v348_v14, %v356_v15  ;;  %v454_v26 = vunpack.c.0.s8 (!%p827_p4), %v453_v25 }
  0xc3   : > { %v457_v28 = vsub.s32 %v454_v26, %v351_v12 }
  0xc4   : > { %409 = vmatpush1.bf16.msra.mxu0 %v996_v6 }
  0xc5   : > { %410 = vmatprep.subr.bf16.mxu0 %v997_v7 }
  0xc8   : > { %411 = vmatpush1.bf16.msra.mxu0 %v999_v8 }
  0xcb   : > { %836 = vmatmul.mubr.msk.bf16.vlgmr.msra.gmra.mrb[0].mxu0 %vm400_vm0, %v339_v10 }
 0x19e   : > { %v438_v18 = vpop.f32.mrb[0].mxu0 }
 0x19f   : > { %v439_v19 = vadd.f32 %v438_v18, %v353_v16  ;;  %v440_v20 = vpop.f32.mrb[1].mxu0 }
 0x1a0   : > { %v441_v21 = vadd.f32 %v440_v20, %v357_v17  ;;  %v442_v22 = vpop.f32.mrb[2].mxu0 }
 0x1a1   : > { %1000 = vtanh.f32 %v439_v19  ;;  %v443_v23 = vpop.f32.mrb[3].mxu0 }
 0x1a2   : > { %1002 = vtanh.f32 %v441_v21 }
 0x1ab   : > { %v1001_v27 = vpop.eup %1000 }
 0x1ac   : > { %v1003_v29 = vpop.eup %1002 }
 0x1ad   : > { %v837_v30 = vpack.c.bf16 %v1003_v29, %v1001_v27 }
 0x1af   : > { %v458_v31 = vrot.slane %v837_v30, %v457_v28 }
 0x1b1   : > { %838 = vst.sshfl [vmem:[#allocation2] sm:$0x5 pattern:$0x73625140] %v458_v31 }
 0x1b2 PF: > { %v1004_v32 = vld [vmem:[%s1540_s27 + $0x40] sm:$0xff]   ;;  %v1006_v34 = vld [vmem:[%s1540_s27 + $0x48] sm:$0xff]   ;;  %v1008_v36 = vld [vmem:[%s1540_s27 + $0x50] sm:$0xff]   ;;  %v520_v41 = vlaneseq  ;;  %v1268_v45 = vmov 1966171168   ;;  %s1677_s24 = sld [smem:[#allocation18_spill]] }
 0x1b3   : > { %v1005_v33 = vld [vmem:[%s1540_s27] sm:$0xff]   ;;  %860 = vmatprep.subr.bf16.mxu0 %v1004_v32  ;;  %v1007_v35 = vld [vmem:[%s1540_s27 + $0x8] sm:$0xff]   ;;  %v1009_v37 = vld [vmem:[%s1540_s27 + $0x10] sm:$0xff]   ;;  %v518_v46 = vunpack.c.l.s4 %v1268_v45  ;;  %s1678_s28 = sld [smem:[#allocation19_spill]]  ;;  %s686_s7 = sshll.u32 %s332_s5, 4  ;;  %s1575_s7 = int_to_ptr.vmem [resolvable:$true] %s686_s7 }
 0x1b4   : > { %861 = vmatpush3.bf16.msra.mxu0 %v1005_v33  ;;  %v1010_v38 = vld [vmem:[%s1540_s27 + $0x58] sm:$0xff]   ;;  %v1012_v40 = vld [vmem:[%s1540_s27 + $0x60] sm:$0xff]   ;;  %v1014_v43 = vld [vmem:[%s1540_s27 + $0x68] sm:$0xff]   ;;  %v521_v47 = vshrl.u32 %v520_v41, 7  ;;  %s1679_s9 = sld [smem:[#allocation24_spill]]  ;;  %s672_s15 = scalar_lea.sflag [#allocation5], %s1537_s12 }
 0x1b5   : > { %862 = vmatprep.subr.bf16.mxu0 %v1006_v34  ;;  %v1011_v39 = vld [vmem:[%s1540_s27 + $0x18] sm:$0xff]   ;;  %v1013_v42 = vld [vmem:[%s1540_s27 + $0x20] sm:$0xff]   ;;  %v1015_v48 = vld [vmem:[%s1540_s27 + $0x28] sm:$0xff]   ;;  %v519_v50 = vunpack.c.0.s8 %v518_v46  ;;  %s1164_s13 = scalar_lea.vmem %s1575_s7, 16  ;;  %s1269_s18 = smov [#allocation12]  }
 0x1b6   : > { %v1016_v51 = vld [vmem:[%s1540_s27 + $0x70] sm:$0xff]   ;;  %v1018_v55 = vld [vmem:[%s1540_s27 + $0x78] sm:$0xff]   ;;  %p1165_p11 = scmp.ne.s32.totalorder %s1575_s7, %s1164_s13  ;;  %s1168_s26 = sshll.u32 %s1269_s18, 4  ;;  %s1169_s26 = int_to_ptr.vmem [resolvable:$false] %s1168_s26 }
 0x1b7   : > { %v522_v52 = vsub.s32 %v519_v50, %v521_v47  ;;  %v1017_v53 = vld [vmem:[%s1540_s27 + $0x30] sm:$0xff]   ;;  %v1019_v56 = vld [vmem:[%s1540_s27 + $0x38] sm:$0xff]   ;;  %s1170_s29 = scalar_lea.vmem %s1169_s26, 32  ;;  %p1171_p0 = scmp.lt.s32.totalorder %s1575_s7, %s1169_s26 }
 0x1b8   : > { %863 = vmatpush3.bf16.msra.mxu0 %v1007_v35  ;;  %v840_v44 = vld.sshfl [vmem:[#allocation2] sm:$0x11 pattern:$0x75316420]  ;;  %s857_s1 = sshll.u32 %s1677_s24, 4  ;;  %p1172_p1 = scmp.lt.s32.totalorder %s1170_s29, %s1164_s13 }
 0x1b9   : > { %864 = vmatprep.subr.bf16.mxu0 %v1008_v36  ;;  %v516_v49 = vcombine.high %v840_v44, %v840_v44  ;;  %v523_v57 = vrot.slane %v840_v44, %v522_v52  ;;  %v839_v59 = vld [vmem:[%s303_s8] ss:$0 sm:$0xff]  ;;  %p1680_p13 = scmp.ne.s32.totalorder %s1678_s28, 0 }
 0x1ba   : > { %s1573_s14 = scalar_lea.hbm %s1679_s9, %s857_s1  ;;  %p1173_p8 = por %p1172_p1, %p1171_p0 }
 0x1bb   : > { %v530_v54 = vrot.slane %v516_v49, %v522_v52  ;;  %p1166_p2 = pnand %p1165_p11, %p1680_p13 }
 0x1bc   : > { %865 = vmatpush3.bf16.msra.mxu0 %v1009_v37 }
 0x1bd   : > { %866 = vmatprep.subr.bf16.mxu0 %v1010_v38  ;;  %661 = vmatprep.mubr.bf16.mxu0 %v530_v54  ;;  %p1167_p12 = pneg %p1166_p2 }
 0x1bf   : > { %p1174_p6 = pnand %p1173_p8, %p1167_p12 }
 0x1c0   : > { %867 = vmatpush3.bf16.msra.mxu0 %v1011_v39 }
 0x1c1   : > { %868 = vmatprep.subr.bf16.mxu0 %v1012_v40 }
 0x1c4   : > { %869 = vmatpush3.bf16.msra.mxu0 %v1013_v42 }
 0x1c5   : > { %870 = vmatprep.subr.bf16.mxu0 %v1014_v43 }
 0x1c8   : > { %871 = vmatpush3.bf16.msra.mxu0 %v1015_v48 }
 0x1c9   : > { %872 = vmatprep.subr.bf16.mxu0 %v1016_v51 }
 0x1cc   : > { %873 = vmatpush3.bf16.msra.mxu0 %v1017_v53 }
 0x1cd   : > { %874 = vmatprep.subr.bf16.mxu0 %v1018_v55 }
 0x1d0   : > { %875 = vmatpush3.bf16.msra.mxu0 %v1019_v56 }
 0x1d3   : > { %662 = vmatmul.mubr.bf16.vlgmr.msra.gmra.mrb[0].mxu0 %v523_v57 }
 0x2a6   : > { %v876_v58 = vpop.f32.mrb[0].mxu0 }
 0x2a7   : > { %v877_v60 = vpop.f32.mrb[1].mxu0 }
 0x2a8   : > { %v878_v61 = vadd.f32 %v877_v60, %v876_v58  ;;  %v879_v62 = vpop.f32.mrb[2].mxu0 }
 0x2a9   : > { %v880_v63 = vpop.f32.mrb[3].mxu0 }
 0x2aa   : > { %v664_v0 = vadd.f32 %v878_v61, %v839_v59 }
 0x2ac   : > { %v669_v1 = vpack.c.bf16 %v664_v0, %v664_v0 }
 0x2ae   : > { %670 = vst [vmem:[%s332_s5] sm:$0x1] %v669_v1 }
 0x2af   : > { %1177 = shalt.err (!%p1174_p6)
}
 0x2b0   : > { %s1178_s17 = scalar_lea.hbm %s1573_s14, 16  ;;  %s1182_s12 = scalar_lea.hbm %s1679_s9, 64 }
 0x2b1   : > { %p1179_p5 = scmp.ne.s32.totalorder %s1573_s14, %s1178_s17  ;;  %p1183_p9 = scmp.lt.u32.totalorder %s1573_s14, %s1679_s9 }
 0x2b2   : > { %p1184_p10 = scmp.lt.u32.totalorder %s1182_s12, %s1178_s17  ;;  %p1186_p11 = scmp.lt.u32.totalorder %s1178_s17, %s1573_s14 }
 0x2b3   : > { %p1180_p3 = pnand %p1179_p5, %p1680_p13 }
 0x2b4   : > { %p1185_p4 = por %p1184_p10, %p1183_p9 }
 0x2b5   : > { %p1181_p7 = pneg %p1180_p3 }
 0x2b6   : > { %p1187_p2 = por %p1186_p11, %p1185_p4 }
 0x2b8   : > { %p1188_p12 = pnand %p1187_p2, %p1181_p7 }
 0x2ba   : > { %1191 = shalt.err (!%p1188_p12)
}
 0x2bb   : > { %898 = dma.vmem_to_hbm [thread:$0]  (%p1680_p13), %s1575_s7, 16, %s1573_s14, %s672_s15  }
 0x2bc PF: > { %s1681_s27 = sld [smem:[#allocation17_spill]]  ;;  %s1682_s8 = sld [smem:[#allocation20_spill]] }
 0x2bd   : > { %p928_p0 = scmp.ge.s32.totalorder %s1254_s23, 2 }
 0x2c2   : > { %s698_s5 = sand.u32 1, %s1681_s27   ;;  %p1683_p1 = scmp.ne.s32.totalorder %s1682_s8, 0 }
 0x2c3   : > { %s699_s25 = scalar_lea.sflag [#allocation5], %s698_s5 }
 0x2c4   : > { %p918_p8 = pnand %p928_p0, %p1683_p1 }
 0x2c6   : > { %1229 = dma.done.wait (!%p918_p8), %s699_s25, 16  }
 0x2c7   : > { %1231 = vsyncadd (!%p918_p8), %s699_s25, 4294967280  ;;  %s23_s23 = sadd.s32 1, %s1254_s23   ;;  %s1684_s24 = sld [smem:[#allocation21_spill]] }
 0x2c8   : > { %p20_p6 = scmp.ge.s32.totalorder %s23_s23, 6   ;;  %s1685_s18 = smov %s1238_s19 }
 0x2c9   : > { %s1686_s19 = smov %s1242_s20  ;;  %s1687_s20 = smov %s1431_s21 }
 0x2ca   : > { %s1688_s21 = smov %s1250_s22  ;;  %22 = sbr.rel (!%p20_p6) target bundleno = 12 (0xc), region = 114 }
 0x2cd   : > { %s1689_s22 = smov %s1684_s24 }
 0x2d1   :  { %703 = vsyncpa [#allocation4], 1 }
 0x2d2   :  { %705 = vsyncpa [#allocation4 + $0x1], 1 }
 0x2d3   :  { %706 = vsyncpa [#allocation7], 1 }
 0x2d4   :  { %707 = vsyncpa [#allocation10], 1 }
 0x2d5   :  { %709 = vsyncpa [#allocation10 + $0x1], 1 }
 0x2d6   :  { %710 = vsyncpa [#allocation5], 1 }
 0x2d7   :  { %712 = vsyncpa [#allocation5 + $0x1], 1 }

</bundles_post_ra>
